<compile_context>
chip_gen: v6e
topology: v6e:2x2x1
jax: 0.10.0
libtpu: 0.0.40
codegen_flags: <defaults>
</compile_context>

<pallas_src>
import functools

import jax
import jax.numpy as jnp
from jax import lax
from jax.experimental import pallas as pl
from jax.experimental.pallas import tpu as pltpu


def _round_up(x, m):
    return (x + m - 1) // m * m


def _vmem_capacity_bytes():
    try:
        return int(pltpu.get_tpu_info().vmem_capacity_bytes)
    except Exception:
        return 64 * 1024 * 1024            # conservative: v7x per-core VMEM


def _choose_tile_m(m, n, ho, wo, k, cout, vmem_cap):
    """Largest row tile that (a) fits a VMEM budget and (b) divides M exactly
    (so the bf16 patch slab never needs an HBM zero-pad pass)."""
    align = 16                              # bf16 sublane packing; covers f32 (8,128)
    budget = int(vmem_cap * 0.55)           # headroom for compiler scratch
    weight_bytes = 2 * k * cout * 2         # double-buffered bf16 weight
    # per row: patches (bf16, 2 bufs) + conv intermediate (bf16, 2 bufs)
    #          + f32 output (2 bufs)
    per_row = 2 * k * 2 + 2 * cout * 2 + 2 * cout * 4
    max_rows = max(align, (budget - weight_bytes) // per_row)
    max_rows = min(max_rows, 4096)

    hw = ho * wo
    if hw % align == 0:                     # whole samples per tile
        for d in range(n, 0, -1):
            if n % d == 0 and d * hw <= max_rows:
                return d * hw
    for d in range(ho, 0, -1):              # whole output rows per tile
        if ho % d == 0 and (d * wo) % align == 0 and d * wo <= max_rows:
            return d * wo
    # Fallback: aligned tile; M gets zero-padded (still correct: zero rows add
    # nothing to the BN sums and the mean divides by the true M).
    return min(_round_up(m, align), max(align, max_rows // align * align))


# ------------------------------------------------------------------ pass 1 --
def _conv_stats_kernel(patches_ref, w_ref, conv_ref, stats_ref):
    acc = jnp.dot(patches_ref[...], w_ref[...],
                  preferred_element_type=jnp.float32)        # (tile_m, Cout) f32
    conv_ref[...] = acc.astype(conv_ref.dtype)               # bf16 intermediate
    s = jnp.sum(acc, axis=0, keepdims=True)                  # f32 accumulator stats
    ss = jnp.sum(acc * acc, axis=0, keepdims=True)
    stats_ref[...] = jnp.concatenate([s, ss], axis=0)[None]  # (1, 2, Cout)


def _stats_only_kernel(patches_ref, w_ref, stats_ref):
    acc = jnp.dot(patches_ref[...], w_ref[...],
                  preferred_element_type=jnp.float32)
    s = jnp.sum(acc, axis=0, keepdims=True)
    ss = jnp.sum(acc * acc, axis=0, keepdims=True)
    stats_ref[...] = jnp.concatenate([s, ss], axis=0)[None]


# ------------------------------------------------------------------ pass 2 --
def _bn_lrelu_kernel(conv_ref, scale_ref, bias_ref, out_ref, *, alpha):
    y = conv_ref[...].astype(jnp.float32) * scale_ref[...] + bias_ref[...]
    out_ref[...] = jnp.where(y >= 0, y, alpha * y).astype(out_ref.dtype)


def _matmul_bn_lrelu_kernel(patches_ref, w_ref, scale_ref, bias_ref, out_ref,
                            *, alpha):
    acc = jnp.dot(patches_ref[...], w_ref[...],
                  preferred_element_type=jnp.float32)
    y = acc * scale_ref[...] + bias_ref[...]
    out_ref[...] = jnp.where(y >= 0, y, alpha * y).astype(out_ref.dtype)


def d_block_forward(x, conv_weight, gamma, beta, *, stride=2, padding=1,
                    alpha=0.2, eps=1e-5, out_dtype=jnp.float32):
    """x: (N, Cin, H, W) NCHW; conv_weight: (Cout, Cin, kh, kw); returns NCHW."""
    n, cin, h, w_sp = x.shape
    cout, cin_w, kh, kw = conv_weight.shape
    assert cin == cin_w

    # Patches directly in NHWC (pad+gather fused by XLA), bf16 MXU inputs.
    # Feature order is c*kh*kw + i*kw + j, matching PyTorch weight.reshape(Cout,-1).
    patches = lax.conv_general_dilated_patches(
        x.astype(jnp.bfloat16), (kh, kw), (stride, stride),
        [(padding, padding), (padding, padding)],
        dimension_numbers=("NCHW", "OIHW", "NHWC"))
    _, ho, wo, k = patches.shape
    m = n * ho * wo
    patches = patches.reshape(m, k)                          # free (metadata)

    w_flat = conv_weight.reshape(cout, k).T.astype(jnp.bfloat16)   # (K, Cout)

    vmem_cap = _vmem_capacity_bytes()
    tile_m = _choose_tile_m(m, n, ho, wo, k, cout, vmem_cap)
    m_pad = _round_up(m, tile_m)
    if m_pad != m:
        patches = jnp.pad(patches, ((0, m_pad - m), (0, 0)))
    num_tiles = m_pad // tile_m
    vmem_limit = int(vmem_cap) * 3 // 4                      # <= 48 MiB on v7x

    # If re-reading the patches is cheaper (in HBM bytes) than round-tripping a
    # bf16 conv intermediate, skip the intermediate and recompute in pass 2.
    use_recompute = (2 * k) < (4 * cout)

    patches_spec = pl.BlockSpec((tile_m, k), lambda i: (i, 0))
    weight_spec = pl.BlockSpec((k, cout), lambda i: (0, 0))   # resident weight
    stats_spec = pl.BlockSpec((1, 2, cout), lambda i: (i, 0, 0))
    row_spec = pl.BlockSpec((tile_m, cout), lambda i: (i, 0))
    chan_spec = pl.BlockSpec((1, cout), lambda i: (0, 0))
    cparams = pltpu.CompilerParams(dimension_semantics=("parallel",),
                                   vmem_limit_bytes=vmem_limit)

    if use_recompute:
        stats = pl.pallas_call(
            _stats_only_kernel,
            out_shape=jax.ShapeDtypeStruct((num_tiles, 2, cout), jnp.float32),
            grid=(num_tiles,),
            in_specs=[patches_spec, weight_spec],
            out_specs=stats_spec,
            compiler_params=cparams,
            cost_estimate=pl.CostEstimate(
                flops=2 * m_pad * k * cout, transcendentals=0,
                bytes_accessed=(patches.size * 2 + w_flat.size * 2
                                + num_tiles * 2 * cout * 4)),
        )(patches, w_flat)
        conv_bf16 = None
    else:
        conv_bf16, stats = pl.pallas_call(
            _conv_stats_kernel,
            out_shape=(jax.ShapeDtypeStruct((m_pad, cout), jnp.bfloat16),
                       jax.ShapeDtypeStruct((num_tiles, 2, cout), jnp.float32)),
            grid=(num_tiles,),
            in_specs=[patches_spec, weight_spec],
            out_specs=(row_spec, stats_spec),
            compiler_params=cparams,
            cost_estimate=pl.CostEstimate(
                flops=2 * m_pad * k * cout, transcendentals=0,
                bytes_accessed=(patches.size * 2 + w_flat.size * 2
                                + m_pad * cout * 2 + num_tiles * 2 * cout * 4)),
        )(patches, w_flat)

    # ---- tiny finalize: reduce per-tile partials, fold BN into scale/bias.
    sums = jnp.sum(stats[:, 0, :], axis=0)                   # (Cout,) f32
    sumsq = jnp.sum(stats[:, 1, :], axis=0)
    mean = sums / m                                          # true M, not padded
    var = jnp.maximum(sumsq / m - mean * mean, 0.0)          # biased batch var
    inv_std = lax.rsqrt(var + eps)
    scale_v = gamma.astype(jnp.float32) * inv_std
    bias_v = beta.astype(jnp.float32) - mean * scale_v
    scale = scale_v.reshape(1, cout)
    bias = bias_v.reshape(1, cout)

    if use_recompute:
        out = pl.pallas_call(
            functools.partial(_matmul_bn_lrelu_kernel, alpha=alpha),
            out_shape=jax.ShapeDtypeStruct((m_pad, cout), out_dtype),
            grid=(num_tiles,),
            in_specs=[patches_spec, weight_spec, chan_spec, chan_spec],
            out_specs=row_spec,
            compiler_params=cparams,
        )(patches, w_flat, scale, bias)
    else:
        out = pl.pallas_call(
            functools.partial(_bn_lrelu_kernel, alpha=alpha),
            out_shape=jax.ShapeDtypeStruct((m_pad, cout), out_dtype),
            grid=(num_tiles,),
            in_specs=[row_spec, chan_spec, chan_spec],
            out_specs=row_spec,
            compiler_params=cparams,
        )(conv_bf16, scale, bias)

    # (M, Cout) NHWC-flat -> (N, Cout, Ho, Wo) (PyTorch NCHW).
    # TODO(synk): fuse this transpose into pass 2 by writing NCHW blocks directly.
    out = out[:m].reshape(n, ho, wo, cout).transpose(0, 3, 1, 2)
    return out


def _reference(x, conv_weight, gamma, beta, *, stride=2, padding=1,
               alpha=0.2, eps=1e-5):
    conv = lax.conv_general_dilated(
        x.astype(jnp.float32), conv_weight.astype(jnp.float32),
        window_strides=(stride, stride),
        padding=((padding, padding), (padding, padding)),
        dimension_numbers=("NCHW", "OIHW", "NCHW"))
    mean = jnp.mean(conv, axis=(0, 2, 3), keepdims=True)
    var = jnp.mean((conv - mean) ** 2, axis=(0, 2, 3), keepdims=True)
    y = (conv - mean) * lax.rsqrt(var + eps)
    y = y * gamma.reshape(1, -1, 1, 1) + beta.reshape(1, -1, 1, 1)
    return jnp.where(y >= 0, y, alpha * y)


if __name__ == "__main__":
    key = jax.random.PRNGKey(0)
    N, CIN, H, W = 2, 3, 16, 16
    KH = KW = 4

    # COUT=8 exercises the bf16-intermediate path; COUT=64 exercises the
    # fused recompute path (K=48 < 2*Cout).
    for COUT in (8, 64):
        k_x, k_w = jax.random.split(jax.random.fold_in(key, COUT))
        x = jax.random.normal(k_x, (N, CIN, H, W), dtype=jnp.float32)
        conv_weight = jax.random.normal(
            k_w, (COUT, CIN, KH, KW), dtype=jnp.float32) * 0.1
        gamma = jnp.ones((COUT,), jnp.float32)   # nn.BatchNorm2d default weight
        beta = jnp.zeros((COUT,), jnp.float32)   # nn.BatchNorm2d default bias

        out = jax.block_until_ready(
            d_block_forward(x, conv_weight, gamma, beta))
        ref = _reference(x, conv_weight, gamma, beta)
        assert out.shape == (N, COUT, H // 2, W // 2), out.shape
        # bf16 MXU inputs (f32 accumulation) vs the all-f32 reference.
        err = float(jnp.max(jnp.abs(out - ref)))
        assert err < 5e-2, (COUT, err)

    print("KERNEL_OK")
</pallas_src>

<mosaic_0001>
module attributes {stable_mosaic.version = 11 : i64} {
  func.func @_conv_stats_kernel(%arg0: i32, %arg1: memref<128x48xbf16, #tpu.memory_space<vmem>>, %arg2: memref<48x8xbf16, #tpu.memory_space<vmem>>, %arg3: memref<128x8xbf16, #tpu.memory_space<vmem>>, %arg4: memref<1x2x8xf32, #tpu.memory_space<vmem>>) attributes {dimension_semantics = [#tpu.dimension_semantics<parallel>], iteration_bounds = array<i64: 1>, scalar_prefetch = 0 : i64, scratch_operands = 0 : i64, tpu.core_type = #tpu.core_type<tc>, window_params = [{transform_indices = @transform_0, window_bounds = array<i64: 128, 48>}, {pipeline_mode = #tpu.pipeline_mode<synchronous>, transform_indices = @transform_1, window_bounds = array<i64: 48, 8>}, {transform_indices = @transform_2, window_bounds = array<i64: 128, 8>}, {transform_indices = @transform_3, window_bounds = array<i64: 1, 2, 8>}]} {
    %c0 = arith.constant 0 : index
    %c0_0 = arith.constant 0 : index
    %0 = vector.load %arg1[%c0, %c0_0] : memref<128x48xbf16, #tpu.memory_space<vmem>>, vector<128x48xbf16>
    %c0_1 = arith.constant 0 : index
    %c0_2 = arith.constant 0 : index
    %1 = vector.load %arg2[%c0_1, %c0_2] : memref<48x8xbf16, #tpu.memory_space<vmem>>, vector<48x8xbf16>
    %cst = arith.constant dense<0.000000e+00> : vector<128x8xf32>
    %2 = tpu.matmul %0, %1, %cst {dimension_numbers = #tpu.dot_dimension_numbers<[1], [0], [0], [1], [0, 0, 1, 1], [], []>} : vector<128x48xbf16>, vector<48x8xbf16>, vector<128x8xf32> -> vector<128x8xf32>
    %3 = arith.truncf %2 : vector<128x8xf32> to vector<128x8xbf16>
    %c0_3 = arith.constant 0 : index
    %c0_4 = arith.constant 0 : index
    %4 = vector.load %arg3[%c0_3, %c0_4] : memref<128x8xbf16, #tpu.memory_space<vmem>>, vector<128x8xbf16>
    tpu.vector_store %arg3[%c0_3, %c0_4], %3 {strides = array<i32>} : memref<128x8xbf16, #tpu.memory_space<vmem>>, vector<128x8xbf16>,
    %cst_5 = arith.constant dense<0.000000e+00> : vector<8xf32>
    %5 = vector.multi_reduction <add>, %2, %cst_5 [0] : vector<128x8xf32> to vector<8xf32>
    %6 = vector.shape_cast %5 : vector<8xf32> to vector<1x8xf32>
    %7 = arith.mulf %2, %2 : vector<128x8xf32>
    %cst_6 = arith.constant dense<0.000000e+00> : vector<8xf32>
    %8 = vector.multi_reduction <add>, %7, %cst_6 [0] : vector<128x8xf32> to vector<8xf32>
    %9 = vector.shape_cast %8 : vector<8xf32> to vector<1x8xf32>
    %10 = tpu.concatenate %6, %9 in 0 : vector<1x8xf32>, vector<1x8xf32> -> vector<2x8xf32>
    %11 = vector.shape_cast %10 : vector<2x8xf32> to vector<1x2x8xf32>
    %c0_7 = arith.constant 0 : index
    %c0_8 = arith.constant 0 : index
    %c0_9 = arith.constant 0 : index
    %12 = vector.load %arg4[%c0_7, %c0_8, %c0_9] : memref<1x2x8xf32, #tpu.memory_space<vmem>>, vector<1x2x8xf32>
    tpu.vector_store %arg4[%c0_7, %c0_8, %c0_9], %11 {strides = array<i32>} : memref<1x2x8xf32, #tpu.memory_space<vmem>>, vector<1x2x8xf32>,
    return
  }
  func.func @transform_0(%arg0: i32) -> (i32, i32) {
    %c0_i32 = arith.constant 0 : i32
    %c0_i32_0 = arith.constant 0 : i32
    return %arg0, %c0_i32 : i32, i32
  }
  func.func @transform_1(%arg0: i32) -> (i32, i32) {
    %c0_i32 = arith.constant 0 : i32
    %c0_i32_0 = arith.constant 0 : i32
    %c0_i32_1 = arith.constant 0 : i32
    return %c0_i32, %c0_i32_0 : i32, i32
  }
  func.func @transform_2(%arg0: i32) -> (i32, i32) {
    %c0_i32 = arith.constant 0 : i32
    %c0_i32_0 = arith.constant 0 : i32
    return %arg0, %c0_i32 : i32, i32
  }
  func.func @transform_3(%arg0: i32) -> (i32, i32, i32) {
    %c0_i32 = arith.constant 0 : i32
    %c0_i32_0 = arith.constant 0 : i32
    %c0_i32_1 = arith.constant 0 : i32
    return %arg0, %c0_i32, %c0_i32_0 : i32, i32, i32
  }
}

</mosaic_0001>

<bundles_post_ra>
// kernel: tpu_custom_call.1
= control target key start
LH: loop header
LB: loop body
LE: loop exit
PB: predicated region body
PF: predicated region fallthrough
CT: control target
= control target key end

     0   :  { %vm95_vm0 = vcmask 392192   ;;  %s745_s0 = inlined_call_operand.vmem [shape: bf16[128,48], index: 0, kind: input, shape index: {}]   ;;  %s746_s1 = inlined_call_operand.vmem [shape: bf16[48,8], index: 1, kind: input, shape index: {}]   ;;  %s747_s2 = inlined_call_operand.vmem [shape: bf16[128,8], index: 2, kind: output, shape index: {0}]   ;;  %s748_s3 = inlined_call_operand.hbm [shape: f32[1,2,8], index: 3, kind: output, shape index: {1}]  }
   0x1   :  { %v502_v0 = vld [vmem:[%s746_s1 + $0x10] sm:$0xff]   ;;  %v503_v1 = vld [vmem:[%s746_s1 + $0x8] sm:$0xff]   ;;  %v505_v2 = vld [vmem:[%s745_s0] sm:$0xff]  }
   0x2   :  { %473 = vmatprep.subr.bf16.mxu0 %v502_v0  ;;  %495 = vmatprep.subr.bf16.mxu1 %v502_v0  ;;  %v504_v3 = vld [vmem:[%s746_s1] sm:$0xff]   ;;  %v506_v5 = vld [vmem:[%s745_s0 + $0x8] sm:$0xff]   ;;  %v507_v7 = vld [vmem:[%s745_s0 + $0x10] sm:$0xff]  }
   0x3   :  { %474 = vmatpush3.bf16.msra.mxu0 %v502_v0  ;;  %498 = vmatpush3.bf16.msra.mxu1 %v502_v0  ;;  %v509_v4 = vld [vmem:[%s745_s0 + $0x20] sm:$0xff]   ;;  %v510_v6 = vld [vmem:[%s745_s0 + $0x28] sm:$0xff]   ;;  %v511_v8 = vld [vmem:[%s745_s0 + $0x30] sm:$0xff]  }
   0x4   :  { %475 = vmatprep.subr.bf16.mxu0 %v503_v1  ;;  %496 = vmatprep.subr.bf16.mxu1 %v503_v1 }
   0x5   :  { %479 = vmatprep.mubr.msk.bf16.mxu0 %vm95_vm0, %v505_v2  ;;  %487 = vmatprep.mubr.msk.bf16.mxu1 %vm95_vm0, %v509_v4 }
   0x7   :  { %476 = vmatpush3.bf16.msra.mxu0 %v503_v1  ;;  %499 = vmatpush3.bf16.msra.mxu1 %v503_v1 }
   0x8   :  { %477 = vmatprep.subr.bf16.mxu0 %v504_v3  ;;  %497 = vmatprep.subr.bf16.mxu1 %v504_v3 }
   0xb   :  { %478 = vmatpush3.bf16.msra.mxu0 %v504_v3  ;;  %500 = vmatpush3.bf16.msra.mxu1 %v504_v3 }
   0xc   :  { %9 = vsyncpa [#allocation3], 0  ;;  %v508_v9 = vld [vmem:[%s745_s0 + $0x18] sm:$0xff]   ;;  %vm281_vm1 = vcmask 60416   ;;  %vm298_vm2 = vcmask 64512   ;;  %vm389_vm3 = vcmask 1040384  }
   0xd   :  { %v512_v10 = vld [vmem:[%s745_s0 + $0x38] sm:$0xff]   ;;  %vm391_vm4 = vcmask 58368  }
   0xe   :  { %480 = vmatmul.mubr.msk.bf16.vlgmr.msra.gmra.mxu0 %vm95_vm0, %v506_v5  ;;  %488 = vmatmul.mubr.msk.bf16.vlgmr.msra.gmra.mxu1 %vm95_vm0, %v510_v6 }
   0xf   :  { %483 = vmatprep.mubr.msk.bf16.mxu0 %vm95_vm0, %v507_v7  ;;  %491 = vmatprep.mubr.msk.bf16.mxu1 %vm95_vm0, %v511_v8 }
  0x16   :  { %484 = vmatmul.mubr.msk.bf16.gmra.mxu0 %vm95_vm0, %v508_v9  ;;  %492 = vmatmul.mubr.msk.bf16.gmra.mxu1 %vm95_vm0, %v512_v10 }
  0xce   :  { %v481_v11 = vpop.f32.mrf.mxu0  ;;  %v597_v12 = vpop.f32.mrf.mxu1 }
  0xcf   :  { %v448_v13 = vpack.c.bf16 %v481_v11, %v481_v11  ;;  %v456_v14 = vpack.c.bf16 %v597_v12, %v597_v12  ;;  %v338_v23 = vmul.f32 %v481_v11, %v481_v11  ;;  %v302_v31 = vsel %vm298_vm2, %v481_v11, 0.0 }
  0xd0   :  { %v154_v15 = vpop.f32.mrf.mxu0  ;;  %v601_v16 = vpop.f32.mrf.mxu1 }
  0xd1   :  { %284 = vst.msk [vmem:[%s747_s2 + $0x8] sm:$0xf] %vm281_vm1, %v448_v13  ;;  %v446_v17 = vpack.c.bf16 %v154_v15, %v154_v15  ;;  %292 = vst.msk [vmem:[%s747_s2 + $0x28] sm:$0xf] %vm281_vm1, %v456_v14  ;;  %v454_v19 = vpack.c.bf16 %v601_v16, %v601_v16  ;;  %v336_v21 = vmul.f32 %v154_v15, %v154_v15  ;;  %v299_v27 = vsel %vm298_vm2, %v154_v15, 0.0 }
  0xd2   :  { %v482_v18 = vpop.f32.mrf.mxu0  ;;  %v613_v20 = vpop.f32.mrf.mxu1  ;;  %v355_v45 = vsel %vm298_vm2, %v338_v23, 0.0  ;;  %v344_v14 = vmul.f32 %v601_v16, %v601_v16 }
  0xd3   :  { %282 = vst.msk [vmem:[%s747_s2] sm:$0xf] %vm281_vm1, %v446_v17  ;;  %v449_v22 = vpack.c.bf16 %v482_v18, %v482_v18  ;;  %290 = vst.msk [vmem:[%s747_s2 + $0x20] sm:$0xf] %vm281_vm1, %v454_v19  ;;  %v457_v25 = vpack.c.bf16 %v613_v20, %v613_v20  ;;  %v352_v36 = vsel %vm298_vm2, %v336_v21, 0.0  ;;  %v339_v37 = vmul.f32 %v482_v18, %v482_v18 }
  0xd4   :  { %v157_v24 = vpop.f32.mrf.mxu0  ;;  %v625_v26 = vpop.f32.mrf.mxu1  ;;  %v304_v46 = vsel %vm298_vm2, %v482_v18, 0.0  ;;  %v314_v19 = vsel %vm298_vm2, %v601_v16, 0.0  ;;  %v347_v16 = vmul.f32 %v613_v20, %v613_v20 }
  0xd5   :  { %285 = vst.msk [vmem:[%s747_s2 + $0xc] sm:$0xf] %vm281_vm1, %v449_v22  ;;  %v447_v28 = vpack.c.bf16 %v157_v24, %v157_v24  ;;  %v300_v29 = vsel %vm298_vm2, %v157_v24, 0.0  ;;  %v337_v30 = vmul.f32 %v157_v24, %v157_v24  ;;  %293 = vst.msk [vmem:[%s747_s2 + $0x2c] sm:$0xf] %vm281_vm1, %v457_v25  ;;  %v455_v34 = vpack.c.bf16 %v625_v26, %v625_v26 }
  0xd6   :  { %v301_v32 = vadd.f32 %v300_v29, %v299_v27  ;;  %v485_v33 = vpop.f32.mrf.mxu0  ;;  %v640_v35 = vpop.f32.mrf.mxu1  ;;  %v357_v53 = vsel %vm298_vm2, %v339_v37, 0.0  ;;  %v345_v21 = vmul.f32 %v625_v26, %v625_v26  ;;  %v346_v24 = vmul.f32 %v597_v12, %v597_v12 }
  0xd7   :  { %283 = vst.msk [vmem:[%s747_s2 + $0x4] sm:$0xf] %vm281_vm1, %v447_v28  ;;  %v353_v38 = vsel %vm298_vm2, %v337_v30, 0.0  ;;  %v452_v39 = vpack.c.bf16 %v485_v33, %v485_v33  ;;  %291 = vst.msk [vmem:[%s747_s2 + $0x24] sm:$0xf] %vm281_vm1, %v455_v34  ;;  %v460_v43 = vpack.c.bf16 %v640_v35, %v640_v35  ;;  %v342_v56 = vmul.f32 %v485_v33, %v485_v33 }
  0xd8   :  { %v303_v40 = vadd.f32 %v302_v31, %v301_v32  ;;  %v354_v41 = vadd.f32 %v353_v38, %v352_v36  ;;  %v170_v42 = vpop.f32.mrf.mxu0  ;;  %v654_v44 = vpop.f32.mrf.mxu1  ;;  %v310_v4 = vsel %vm298_vm2, %v485_v33, 0.0  ;;  %v367_v25 = vsel %vm298_vm2, %v344_v14, 0.0 }
  0xd9   :  { %288 = vst.msk [vmem:[%s747_s2 + $0x18] sm:$0xf] %vm281_vm1, %v452_v39  ;;  %v450_v47 = vpack.c.bf16 %v170_v42, %v170_v42  ;;  %v340_v48 = vmul.f32 %v170_v42, %v170_v42  ;;  %296 = vst.msk [vmem:[%s747_s2 + $0x38] sm:$0xf] %vm281_vm1, %v460_v43  ;;  %v306_v54 = vsel %vm298_vm2, %v170_v42, 0.0  ;;  %v458_v60 = vpack.c.bf16 %v654_v44, %v654_v44 }
  0xda   :  { %v356_v49 = vadd.f32 %v355_v45, %v354_v41  ;;  %v305_v50 = vadd.f32 %v304_v46, %v303_v40  ;;  %v486_v51 = vpop.f32.mrf.mxu0  ;;  %v666_v52 = vpop.f32.mrf.mxu1  ;;  %v363_v11 = vsel %vm298_vm2, %v342_v56, 0.0  ;;  %v316_v27 = vsel %vm298_vm2, %v625_v26, 0.0 }
  0xdb   :  { %286 = vst.msk [vmem:[%s747_s2 + $0x10] sm:$0xf] %vm281_vm1, %v450_v47  ;;  %v453_v55 = vpack.c.bf16 %v486_v51, %v486_v51  ;;  %v359_v61 = vsel %vm298_vm2, %v340_v48, 0.0  ;;  %294 = vst.msk [vmem:[%s747_s2 + $0x30] sm:$0xf] %vm281_vm1, %v458_v60  ;;  %v343_v5 = vmul.f32 %v486_v51, %v486_v51  ;;  %v461_v7 = vpack.c.bf16 %v666_v52, %v666_v52 }
  0xdc   :  { %v307_v57 = vadd.f32 %v306_v54, %v305_v50  ;;  %v358_v58 = vadd.f32 %v357_v53, %v356_v49  ;;  %v173_v59 = vpop.f32.mrf.mxu0  ;;  %v205_v1 = vpop.f32.mrf.mxu1  ;;  %v312_v13 = vsel %vm298_vm2, %v486_v51, 0.0  ;;  %v318_v30 = vsel %vm298_vm2, %v597_v12, 0.0 }
  0xdd   :  { %289 = vst.msk [vmem:[%s747_s2 + $0x1c] sm:$0xf] %vm281_vm1, %v453_v55  ;;  %v451_v62 = vpack.c.bf16 %v173_v59, %v173_v59  ;;  %v308_v63 = vsel %vm298_vm2, %v173_v59, 0.0  ;;  %v341_v0 = vmul.f32 %v173_v59, %v173_v59  ;;  %v459_v10 = vpack.c.bf16 %v205_v1, %v205_v1  ;;  %297 = vst.msk [vmem:[%s747_s2 + $0x3c] sm:$0xf] %vm281_vm1, %v461_v7 }
  0xde   :  { %v360_v2 = vadd.f32 %v359_v61, %v358_v58  ;;  %v309_v3 = vadd.f32 %v308_v63, %v307_v57  ;;  %v365_v18 = vsel %vm298_vm2, %v343_v5, 0.0  ;;  %v369_v31 = vsel %vm298_vm2, %v345_v21, 0.0 }
  0xdf   :  { %287 = vst.msk [vmem:[%s747_s2 + $0x14] sm:$0xf] %vm281_vm1, %v451_v62  ;;  %v361_v6 = vsel %vm298_vm2, %v341_v0, 0.0  ;;  %295 = vst.msk [vmem:[%s747_s2 + $0x34] sm:$0xf] %vm281_vm1, %v459_v10  ;;  %v371_v34 = vsel %vm298_vm2, %v346_v24, 0.0  ;;  %v348_v26 = vmul.f32 %v654_v44, %v654_v44  ;;  %v349_v40 = vmul.f32 %v205_v1, %v205_v1 }
  0xe0   :  { %v311_v8 = vadd.f32 %v310_v4, %v309_v3  ;;  %v362_v9 = vadd.f32 %v361_v6, %v360_v2  ;;  %v320_v36 = vsel %vm298_vm2, %v613_v20, 0.0  ;;  %v373_v39 = vsel %vm298_vm2, %v347_v16, 0.0  ;;  %s535_s2 = smov [#allocation2]  }
  0xe1   :  { %v322_v12 = vsel %vm298_vm2, %v654_v44, 0.0  ;;  %v350_v43 = vmul.f32 %v640_v35, %v640_v35  ;;  %v375_v45 = vsel %vm298_vm2, %v348_v26, 0.0  ;;  %v324_v20 = vsel %vm298_vm2, %v205_v1, 0.0  ;;  %s401_s8 = sshll.u32 %s535_s2, 4  ;;  %s402_s8 = int_to_ptr.vmem [resolvable:$true] %s401_s8 }
  0xe2   :  { %v313_v15 = vadd.f32 %v312_v13, %v311_v8  ;;  %v364_v17 = vadd.f32 %v363_v11, %v362_v9  ;;  %v326_v48 = vsel %vm298_vm2, %v640_v35, 0.0  ;;  %v351_v49 = vmul.f32 %v666_v52, %v666_v52  ;;  %s513_s9 = scalar_lea.vmem %s402_s8, 32  ;;  %p518_p1 = scmp.lt.s32.totalorder %s402_s8, %s402_s8 }
  0xe3   :  { %v377_v44 = vsel %vm298_vm2, %v349_v40, 0.0  ;;  %v379_v53 = vsel %vm298_vm2, %v350_v43, 0.0  ;;  %v328_v54 = vsel %vm298_vm2, %v666_v52, 0.0  ;;  %p514_p0 = scmp.ne.s32.totalorder %s402_s8, %s513_s9  ;;  %p519_p2 = scmp.lt.s32.totalorder %s513_s9, %s513_s9 }
  0xe4   :  { %v366_v22 = vadd.f32 %v365_v18, %v364_v17  ;;  %v315_v23 = vadd.f32 %v314_v19, %v313_v15  ;;  %v381_v57 = vsel %vm298_vm2, %v351_v49, 0.0 }
  0xe5   :  { %p520_p3 = por %p519_p2, %p518_p1 }
  0xe6   :  { %v317_v28 = vadd.f32 %v316_v27, %v315_v23  ;;  %v368_v29 = vadd.f32 %v367_v25, %v366_v22 }
  0xe7   :  { %p521_p4 = pnand %p520_p3, %p514_p0 }
  0xe8   :  { %v319_v32 = vadd.f32 %v318_v30, %v317_v28  ;;  %v370_v33 = vadd.f32 %v369_v31, %v368_v29 }
  0xea   :  { %v372_v37 = vadd.f32 %v371_v34, %v370_v33  ;;  %v321_v38 = vadd.f32 %v320_v36, %v319_v32 }
  0xec   :  { %v323_v41 = vadd.f32 %v322_v12, %v321_v38  ;;  %v374_v42 = vadd.f32 %v373_v39, %v372_v37 }
  0xee   :  { %v376_v46 = vadd.f32 %v375_v45, %v374_v42  ;;  %v325_v47 = vadd.f32 %v324_v20, %v323_v41 }
  0xf0   :  { %v327_v50 = vadd.f32 %v326_v48, %v325_v47  ;;  %v378_v51 = vadd.f32 %v377_v44, %v376_v46 }
  0xf2   :  { %v329_v55 = vadd.f32 %v328_v54, %v327_v50  ;;  %v380_v56 = vadd.f32 %v379_v53, %v378_v51 }
  0xf4   :  { %v330_v58 = vrot.slane %v329_v55, 4  ;;  %v382_v59 = vadd.f32 %v381_v57, %v380_v56 }
  0xf6   :  { %v331_v60 = vadd.f32 %v330_v58, %v329_v55  ;;  %v383_v35 = vrot.slane %v382_v59, 4 }
  0xf8   :  { %v332_v61 = vrot.slane %v331_v60, 2  ;;  %v384_v62 = vadd.f32 %v383_v35, %v382_v59 }
  0xfa   :  { %v333_v63 = vadd.f32 %v332_v61, %v331_v60  ;;  %v385_v0 = vrot.slane %v384_v62, 2 }
  0xfc   :  { %v334_v1 = vrot.slane %v333_v63, 1  ;;  %v386_v2 = vadd.f32 %v385_v0, %v384_v62 }
  0xfe   :  { %v387_v3 = vrot.slane %v386_v2, 1  ;;  %v335_v4 = vadd.f32 %v334_v1, %v333_v63 }
 0x100   :  { %v388_v52 = vadd.f32 %v387_v3, %v386_v2 }
 0x102   :  { %v390_v5 = vsel %vm389_vm3, %v335_v4, %v388_v52 }
 0x103   :  { %392 = vst.msk [vmem:[#allocation2] sm:$0x3] %vm391_vm4, %v390_v5 }
 0x104   :  { %524 = shalt.err (!%p521_p4)
}
 0x105   :  { %404 = dma.vmem_to_hbm [thread:$0]  %s402_s8, 32, %s748_s3, [#allocation3]  }
 0x106   :  { %533 = dma.done.wait [#allocation3], 32  }
 0x107   :  { %534 = vsyncadd [#allocation3], 4294967264 }
 0x108   :  { %410 = vsyncpa [#allocation3], 1 }

</bundles_post_ra>
